<compile_context>
chip_gen: v7x
topology: tpu7x:2x2x1
jax: 0.10.0
libtpu: 0.0.40
codegen_flags: <defaults>
</compile_context>

<pallas_src>
import math

import jax
import jax.numpy as jnp
from jax import lax
from jax.experimental import pallas as pl
from jax.experimental.pallas import tpu as pltpu


def _make_kernel(g, sh, sw, W):
    """Build the kernel for a fixed (group size, height scale, width scale, W)."""
    L = sw * W  # width-replicated length of one original row

    def kernel(x_ref, sel_ref, o_ref):
        # x_ref:   (TR, g*W)       g input rows per "super row"
        # sel_ref: (g*W, g*sw*W)   constant 0/1 width-replication selector
        # o_ref:   (TR, g*sh*sw*W) fully replicated output rows
        # Width replication on the MXU: each selector column picks exactly one
        # input column, so the matmul is an exact copy (HIGHEST precision keeps
        # f32 exact through the MXU).
        y = jnp.dot(
            x_ref[...],
            sel_ref[...],
            precision=lax.Precision.HIGHEST,
            preferred_element_type=jnp.float32,
        ).astype(o_ref.dtype)
        # Height replication: sh static-offset stores per group (vreg copies
        # inside VMEM; the HBM writeback DMA stays one big lane-dense block).
        for a in range(g):
            ya = y if g == 1 else y[:, a * L:(a + 1) * L]
            for i in range(sh):
                off = (a * sh + i) * L
                o_ref[:, off:off + L] = ya

    return kernel


def _int_scale(s):
    si = int(round(float(s)))
    if si < 1 or abs(float(s) - si) > 1e-6:
        # TODO(synk): non-integer scale factors (general nearest gather) not implemented.
        raise NotImplementedError("only integer scale factors are supported")
    return si


def _largest_divisor(n, cap, multiple_of):
    best = 0
    d = 1
    while d * d <= n:
        if n % d == 0:
            for c in (d, n // d):
                if c <= cap and c % multiple_of == 0 and c > best:
                    best = c
        d += 1
    return best


def upsample_nearest(x, scale_factor=2.0):
    """Equivalent of nn.Upsample(scale_factor=scale_factor, mode='nearest')(x)."""
    # TODO(synk): `size=`, non-'nearest' modes and align_corners are not implemented.
    if isinstance(scale_factor, (tuple, list)):
        sh, sw = (_int_scale(s) for s in scale_factor)
    else:
        sh = sw = _int_scale(scale_factor)
    if not jnp.issubdtype(x.dtype, jnp.floating):
        # TODO(synk): integer dtypes would need a non-MXU replication path.
        raise NotImplementedError("floating-point inputs only")

    N, C, H, W = x.shape
    out_h, out_w = H * sh, W * sw
    total_rows = N * C * H
    L = sw * W                               # width-replicated row length
    base = sh * L                            # output elements per input row

    # --- row group g: make the output last dim a multiple of 128 lanes ------
    g = 128 // math.gcd(base, 128)           # smallest g with (g*base) % 128 == 0
    if total_rows % g != 0 or g * W > 512:   # keep the selector matmul cheap
        g = 1
    n_sup = total_rows // g                  # number of "super rows"
    in_cols = g * W
    sel_cols = g * L
    out_cols = g * base

    # --- row tile: big DMAs, bounded VMEM footprint --------------------------
    el = jnp.dtype(x.dtype).itemsize
    sub = 16 if el == 2 else 8               # sublane packing (bf16/f16 -> 16)
    tr_cap = max(sub, (4 * 1024 * 1024) // (out_cols * el))   # ~4 MiB out tile
    tr = _largest_divisor(n_sup, tr_cap, sub)
    if tr == 0 and sub != 8:
        tr = _largest_divisor(n_sup, tr_cap, 8)
    if tr == 0:
        tr = n_sup                            # full extent is always legal
    # Prefer >= 2 grid steps so v7x can shard the axis across its 2 TCs.
    if n_sup // tr < 2 and tr % (2 * sub) == 0:
        tr //= 2
    grid = (n_sup // tr,)

    # --- constant 0/1 width-replication selector (stays resident in VMEM) ----
    row = jnp.arange(in_cols)
    col = jnp.arange(sel_cols)
    sel = ((row[:, None] // W) == (col[None, :] // L)) & (
        (row[:, None] % W) == ((col[None, :] % L) // sw)
    )
    sel = sel.astype(x.dtype)

    x2 = x.reshape(n_sup, in_cols)            # contiguity-preserving

    vmem_need = (2 * tr * (in_cols + out_cols) * el          # in/out, double-buffered
                 + 2 * in_cols * sel_cols * el                # selector, double-buffered
                 + tr * sel_cols * 4)                         # f32 matmul intermediate
    vmem_limit = int(min(max(vmem_need + (4 << 20), 16 << 20), 48 << 20))

    kernel = _make_kernel(g, sh, sw, W)

    out2 = pl.pallas_call(
        kernel,
        out_shape=jax.ShapeDtypeStruct((n_sup, out_cols), x.dtype),
        grid=grid,
        in_specs=[
            pl.BlockSpec((tr, in_cols), lambda i: (i, 0)),
            pl.BlockSpec((in_cols, sel_cols), lambda i: (0, 0)),
        ],
        out_specs=pl.BlockSpec((tr, out_cols), lambda i: (i, 0)),
        compiler_params=pltpu.CompilerParams(
            dimension_semantics=("parallel",),
            vmem_limit_bytes=vmem_limit,
        ),
    )(x2, sel)

    return out2.reshape(N, C, out_h, out_w)   # contiguity-preserving


if __name__ == "__main__":
    key = jax.random.PRNGKey(0)
    k1, k2 = jax.random.split(key)

    # Case 1: small feature map (grouped path, g > 1): N=2, C=4, H=W=16, f32.
    x1 = jax.random.normal(k1, (2, 4, 16, 16), dtype=jnp.float32)
    y1 = jax.block_until_ready(upsample_nearest(x1, scale_factor=2.0))
    ref1 = jnp.repeat(jnp.repeat(x1, 2, axis=2), 2, axis=3)
    assert y1.shape == (2, 4, 32, 32), y1.shape
    assert y1.dtype == x1.dtype
    assert jnp.array_equal(y1, ref1), "case1: mismatch vs nearest-upsample reference"

    # Case 2: wider row (g == 1, lane-dense path): N=1, C=2, H=32, W=64, f32.
    x2 = jax.random.normal(k2, (1, 2, 32, 64), dtype=jnp.float32)
    y2 = jax.block_until_ready(upsample_nearest(x2, scale_factor=2.0))
    ref2 = jnp.repeat(jnp.repeat(x2, 2, axis=2), 2, axis=3)
    assert y2.shape == (1, 2, 64, 128), y2.shape
    assert jnp.array_equal(y2, ref2), "case2: mismatch vs nearest-upsample reference"

    # Case 3: bf16 input (16-sublane packing path).
    x3 = x1.astype(jnp.bfloat16)
    y3 = jax.block_until_ready(upsample_nearest(x3, scale_factor=2.0))
    ref3 = jnp.repeat(jnp.repeat(x3, 2, axis=2), 2, axis=3)
    assert y3.dtype == jnp.bfloat16
    assert jnp.array_equal(y3, ref3), "case3: mismatch vs nearest-upsample reference"

    print("KERNEL_OK")
</pallas_src>

<mosaic_0001>
module attributes {stable_mosaic.version = 11 : i64} {
  func.func @kernel(%arg0: i32, %arg1: memref<32x32xf32, #tpu.memory_space<vmem>>, %arg2: memref<32x64xf32, #tpu.memory_space<vmem>>, %arg3: memref<32x128xf32, #tpu.memory_space<vmem>>) attributes {dimension_semantics = [#tpu.dimension_semantics<parallel>], iteration_bounds = array<i64: 2>, scalar_prefetch = 0 : i64, scratch_operands = 0 : i64, tpu.core_type = #tpu.core_type<tc>, window_params = [{transform_indices = @transform_0, window_bounds = array<i64: 32, 32>}, {pipeline_mode = #tpu.pipeline_mode<synchronous>, transform_indices = @transform_1, window_bounds = array<i64: 32, 64>}, {transform_indices = @transform_2, window_bounds = array<i64: 32, 128>}]} {
    %c0 = arith.constant 0 : index
    %c0_0 = arith.constant 0 : index
    %0 = vector.load %arg1[%c0, %c0_0] : memref<32x32xf32, #tpu.memory_space<vmem>>, vector<32x32xf32>
    %c0_1 = arith.constant 0 : index
    %c0_2 = arith.constant 0 : index
    %1 = vector.load %arg2[%c0_1, %c0_2] : memref<32x64xf32, #tpu.memory_space<vmem>>, vector<32x64xf32>
    %cst = arith.constant dense<0.000000e+00> : vector<32x64xf32>
    %2 = tpu.matmul %0, %1, %cst {dimension_numbers = #tpu.dot_dimension_numbers<[1], [0], [0], [1], [0, 0, 1, 1], [], []>, precision = #tpu.contract_precision<fp32>} : vector<32x32xf32>, vector<32x64xf32>, vector<32x64xf32> -> vector<32x64xf32>
    %3 = vector.extract_strided_slice %2 {offsets = [0, 0], sizes = [32, 32], strides = [1, 1]} : vector<32x64xf32> to vector<32x32xf32>
    %c0_3 = arith.constant 0 : index
    %c0_4 = arith.constant 0 : index
    %4 = vector.load %arg3[%c0_3, %c0_4] : memref<32x128xf32, #tpu.memory_space<vmem>>, vector<32x32xf32>
    tpu.vector_store %arg3[%c0_3, %c0_4], %3 {strides = array<i32>} : memref<32x128xf32, #tpu.memory_space<vmem>>, vector<32x32xf32>,
    %c0_5 = arith.constant 0 : index
    %c32 = arith.constant 32 : index
    %5 = vector.load %arg3[%c0_5, %c32] : memref<32x128xf32, #tpu.memory_space<vmem>>, vector<32x32xf32>
    tpu.vector_store %arg3[%c0_5, %c32], %3 {strides = array<i32>} : memref<32x128xf32, #tpu.memory_space<vmem>>, vector<32x32xf32>,
    %6 = vector.extract_strided_slice %2 {offsets = [0, 32], sizes = [32, 32], strides = [1, 1]} : vector<32x64xf32> to vector<32x32xf32>
    %c0_6 = arith.constant 0 : index
    %c64 = arith.constant 64 : index
    %7 = vector.load %arg3[%c0_6, %c64] : memref<32x128xf32, #tpu.memory_space<vmem>>, vector<32x32xf32>
    tpu.vector_store %arg3[%c0_6, %c64], %6 {strides = array<i32>} : memref<32x128xf32, #tpu.memory_space<vmem>>, vector<32x32xf32>,
    %c0_7 = arith.constant 0 : index
    %c96 = arith.constant 96 : index
    %8 = vector.load %arg3[%c0_7, %c96] : memref<32x128xf32, #tpu.memory_space<vmem>>, vector<32x32xf32>
    tpu.vector_store %arg3[%c0_7, %c96], %6 {strides = array<i32>} : memref<32x128xf32, #tpu.memory_space<vmem>>, vector<32x32xf32>,
    return
  }
  func.func @transform_0(%arg0: i32) -> (i32, i32) {
    %c0_i32 = arith.constant 0 : i32
    %c0_i32_0 = arith.constant 0 : i32
    return %arg0, %c0_i32 : i32, i32
  }
  func.func @transform_1(%arg0: i32) -> (i32, i32) {
    %c0_i32 = arith.constant 0 : i32
    %c0_i32_0 = arith.constant 0 : i32
    %c0_i32_1 = arith.constant 0 : i32
    return %c0_i32, %c0_i32_0 : i32, i32
  }
  func.func @transform_2(%arg0: i32) -> (i32, i32) {
    %c0_i32 = arith.constant 0 : i32
    %c0_i32_0 = arith.constant 0 : i32
    return %arg0, %c0_i32 : i32, i32
  }
}

</mosaic_0001>

<bundles_post_ra>
// kernel: tpu_custom_call.1
= control target key start
LH: loop header
LB: loop body
LE: loop exit
PB: predicated region body
PF: predicated region fallthrough
CT: control target
= control target key end

     0   :  { %7 = vsyncpa [#allocation3], 0  ;;  %s1448_s0 = inlined_call_operand.vmem [shape: f32[64,32], index: 0, kind: input, shape index: {}]   ;;  %s1449_s1 = inlined_call_operand.vmem [shape: f32[32,64], index: 1, kind: input, shape index: {}]   ;;  %s1450_s2 = inlined_call_operand.hbm [shape: f32[64,128], index: 2, kind: output, shape index: {}]  }
   0x1   :  { %9 = vsyncpa [#allocation3 + $0x1], 0  ;;  %s1243_s9 = smov 0   ;;  %s1245_s10 = smov 0  }
   0x2   :  { %s1247_s11 = smov 0   ;;  %s1249_s12 = smov 0  }
   0x3 LB: > { %s1264_s13 = sadd.s32 4294967295, %s1221_s12   ;;  %s903_s14 = sadd.s32 4294967294, %s1221_s12   ;;  %s1221_s12 = sphi %s1249_s12, %s1456_s12   ;;  %s1217_s11 = sphi %s1247_s11, %s1455_s11   ;;  %s1213_s10 = sphi %s1245_s10, %s1454_s10   ;;  %s1209_s9 = sphi %s1243_s9, %s1453_s9  }
   0x4   : > { %s1268_s15 = sadd.s32 1, %s1221_s12   ;;  %s69_s16 = sadd.s32 1, %s1217_s11 }
   0x5   : > { %s66_s17 = ssub.s32 %s1221_s12, %s1268_s15  ;;  %p79_p0 = scmp.ne.s32.totalorder %s1217_s11, %s1213_s10 }
   0x6   : > { %p67_p1 = scmp.eq.s32.totalorder %s66_s17, 0  ;;  %p80_p2 = scmp.eq.s32.totalorder %s1264_s13, 1 }
   0x7   : > { %p85_p3 = scmp.ne.s32.totalorder %s1213_s10, %s1209_s9  ;;  %p86_p4 = scmp.eq.s32.totalorder %s903_s14, 1 }
   0x8   : > { %s1279_s18 = scalar_select %p67_p1, %s1217_s11, %s69_s16  }
   0x9   : > { %p1281_p5 = por %p80_p2, %p79_p0  ;;  %p1285_p6 = por %p86_p4, %p85_p3 }
   0xa   : > { %p906_p7 = scmp.ge.s32.totalorder %s1221_s12, 1  ;;  %p116_p8 = scmp.lt.s32.totalorder %s1221_s12, 3 }
   0xc   : > { %p117_p9 = pnand %p906_p7, %p116_p8 }
   0xd   : > { %v149_v0 = vld [vmem:[%s1449_s1] sm:$0xff] (!%p117_p9)  ;;  %v150_v1 = vld [vmem:[%s1449_s1 + $0x8] sm:$0xff] (!%p117_p9)  ;;  %v151_v2 = vld [vmem:[%s1449_s1 + $0x10] sm:$0xff] (!%p117_p9)  ;;  %s908_s27 = sshll.u32 (!%p117_p9), %s1264_s13, 2  ;;  %vm153_vm0 = vcmask (!%p117_p9), 261120   ;;  %s135_s6 = sand.u32 (!%p117_p9), 1, %s1213_s10  }
   0xe   : > { %120 = sbr.rel (%p117_p9) target bundleno = 409 (0x199), region = 28  ;;  %v167_v3 = vand.u32 (!%p117_p9), 4294901760, %v149_v0  ;;  %v170_v4 = vand.u32 (!%p117_p9), 4294901760, %v150_v1  ;;  %v152_v5 = vld [vmem:[%s1449_s1 + $0x18] sm:$0xff] (!%p117_p9)  ;;  %v173_v6 = vand.u32 (!%p117_p9), 4294901760, %v151_v2  ;;  %p139_p10 = scmp.lt.s32.totalorder (!%p117_p9), %s908_s27, 7 }
   0xf   : > { %v176_v7 = vand.u32 (!%p117_p9), 4294901760, %v152_v5  ;;  %s907_s7 = sshll.u32 (!%p117_p9), %s135_s6, 5  ;;  %s1223_s14 = smov (!%p117_p9), 64   ;;  %vm800_vm1 = vcmask (!%p117_p9), 523520   ;;  %vm805_vm2 = vcmask (!%p117_p9), 785920   ;;  %vm822_vm3 = vcmask (!%p117_p9), 1048320  }
  0x10   : > { %v1304_v8 = vpack.c.bf16 (!%p117_p9), %v170_v4, %v167_v3  ;;  %v1306_v9 = vsub.f32 (!%p117_p9), %v149_v0, %v167_v3  ;;  %v1308_v10 = vsub.f32 (!%p117_p9), %v150_v1, %v170_v4  ;;  %v1310_v11 = vsub.f32 (!%p117_p9), %v151_v2, %v173_v6  ;;  %s1362_s8 = scalar_lea.vmem (!%p117_p9), [#allocation2], %s907_s7  ;;  %s1224_s16 = smov (!%p117_p9), 32  }
  0x11   : > { %v1312_v12 = vpack.c.bf16 (!%p117_p9), %v176_v7, %v173_v6  ;;  %v1314_v13 = vsub.f32 (!%p117_p9), %v152_v5, %v176_v7  ;;  %s915_s17 = sshll.u32 (!%p117_p9), %s1264_s13, 9  ;;  %s841_s21 = sshll.u32 (!%p117_p9), %s1362_s8, 4  ;;  %s1399_s21 = int_to_ptr.vmem [resolvable:$true] %s841_s21 }
  0x12   : > { %1073 = vmatprep.subr.bf16.mxu0 (!%p117_p9), %v1304_v8  ;;  %1049 = vmatprep.subr.bf16.mxu1 (!%p117_p9), %v1304_v8  ;;  %v278_v14 = vand.u32 (!%p117_p9), 4294901760, %v1306_v9  ;;  %v285_v15 = vand.u32 (!%p117_p9), 4294901760, %v1308_v10  ;;  %v292_v16 = vand.u32 (!%p117_p9), 4294901760, %v1310_v11  ;;  %v1064_v58 = vpack.c.bf16 (!%p117_p9), %v1308_v10, %v1306_v9  ;;  %s1397_s24 = scalar_lea.hbm (!%p117_p9), %s1450_s2, %s915_s17  ;;  %s1407_s13 = scalar_lea.sflag (!%p117_p9), [#allocation3], %s135_s6 }
  0x13   : > { %1075 = vmatpush3.bf16.msra.mxu0 (!%p117_p9), %v1304_v8  ;;  %1051 = vmatpush3.bf16.msra.mxu1 (!%p117_p9), %v1304_v8  ;;  %v299_v17 = vand.u32 (!%p117_p9), 4294901760, %v1314_v13  ;;  %v1068_v59 = vpack.c.bf16 (!%p117_p9), %v1314_v13, %v1310_v11  ;;  %s1159_s25 = scalar_lea.vmem (!%p117_p9), %s1399_s21, 512  ;;  %s1225_s26 = smov (!%p117_p9), [#allocation2]  }
  0x14   : > { %1077 = vmatprep.subr.bf16.mxu0 (!%p117_p9), %v1312_v12  ;;  %1053 = vmatprep.subr.bf16.mxu1 (!%p117_p9), %v1312_v12  ;;  %v1080_v20 = vpack.c.bf16 (!%p117_p9), %v285_v15, %v278_v14  ;;  %v279_v21 = vsub.f32 (!%p117_p9), %v1306_v9, %v278_v14  ;;  %v286_v22 = vsub.f32 (!%p117_p9), %v1308_v10, %v285_v15  ;;  %p1160_p11 = scmp.ne.s32.totalorder (!%p117_p9), %s1399_s21, %s1159_s25 }
  0x15   : > { %s1458_s27 = smov (!%p139_p10, %s908_s27), 7  ;;  %v293_v34 = vsub.f32 %v1310_v11, %v292_v16  ;;  %v300_v35 = vsub.f32 %v1314_v13, %v299_v17  ;;  %v1084_v45 = vpack.c.bf16 %v299_v17, %v292_v16 }
  0x16   : > { %s909_s30 = sshll.u32 %s1458_s27, 3  ;;  %v280_v30 = vand.u32 4294901760, %v279_v21  ;;  %v287_v31 = vand.u32 4294901760, %v286_v22  ;;  %p1161_p12 = pnand %p1160_p11, %p1281_p5 }
  0x17   : > { %s142_s5 = scalar_lea.vmem %s1448_s0, %s909_s30  ;;  %1079 = vmatpush3.bf16.msra.mxu0 %v1312_v12  ;;  %1055 = vmatpush3.bf16.msra.mxu1 %v1312_v12  ;;  %v294_v46 = vand.u32 4294901760, %v293_v34  ;;  %v301_v47 = vand.u32 4294901760, %v300_v35  ;;  %s1163_s27 = sshll.u32 %s1225_s26, 4  ;;  %s1164_s27 = int_to_ptr.vmem [resolvable:$false] %s1163_s27 }
  0x18   : > { %v145_v18 = vld [vmem:[%s142_s5] sm:$0xff]  ;;  %v146_v19 = vld [vmem:[%s142_s5 + $0x8] sm:$0xff]  ;;  %v147_v23 = vld [vmem:[%s142_s5 + $0x10] sm:$0xff]  ;;  %1081 = vmatprep.subr.bf16.mxu0 %v1080_v20  ;;  %v1056_v38 = vpack.c.bf16 %v287_v31, %v280_v30  ;;  %p1162_p13 = pneg %p1161_p12  ;;  %s1165_s28 = scalar_lea.vmem %s1164_s27, 1024 }
  0x19   : > { %v155_v24 = vsel %vm153_vm0, %v145_v18, 0  ;;  %v158_v25 = vsel %vm153_vm0, %v146_v19, 0  ;;  %v161_v26 = vsel %vm153_vm0, %v147_v23, 0  ;;  %v148_v27 = vld [vmem:[%s142_s5 + $0x18] sm:$0xff]  ;;  %v1060_v56 = vpack.c.bf16 %v301_v47, %v294_v46  ;;  %p1166_p0 = scmp.lt.s32.totalorder %s1399_s21, %s1164_s27  ;;  %p1167_p1 = scmp.lt.s32.totalorder %s1165_s28, %s1159_s25 }
  0x1a   : > { %v1334_v28 = vand.u32 4294901760, %v155_v24  ;;  %v1336_v29 = vand.u32 4294901760, %v158_v25  ;;  %v255_v32 = vand.u32 4294901760, %v161_v26  ;;  %v164_v33 = vsel %vm153_vm0, %v148_v27, 0  ;;  %1057 = vmatprep.subr.bf16.mxu1 %v1056_v38 }
  0x1b   : > { %v265_v39 = vand.u32 4294901760, %v164_v33  ;;  %p1168_p2 = por %p1167_p1, %p1166_p0 }
  0x1c   : > { %v236_v36 = vsub.f32 %v155_v24, %v1334_v28  ;;  %v246_v37 = vsub.f32 %v158_v25, %v1336_v29  ;;  %v256_v40 = vsub.f32 %v161_v26, %v255_v32 }
  0x1d   : > { %v266_v43 = vsub.f32 %v164_v33, %v265_v39  ;;  %p1169_p3 = pnand %p1168_p2, %p1162_p13 }
  0x1e   : > { %v237_v41 = vand.u32 4294901760, %v236_v36  ;;  %v247_v42 = vand.u32 4294901760, %v246_v37  ;;  %v257_v44 = vand.u32 4294901760, %v256_v40 }
  0x1f   : > { %v267_v50 = vand.u32 4294901760, %v266_v43 }
  0x20   : > { %1014 = vmatprep.mubr.f32.mxu0 %v237_v41  ;;  %v238_v48 = vsub.f32 %v236_v36, %v237_v41  ;;  %v248_v49 = vsub.f32 %v246_v37, %v247_v42  ;;  %v258_v51 = vsub.f32 %v256_v40, %v257_v44 }
  0x21   : > { %1015 = vmatmul.mubr.f32.vlgmr.msra.gmra.mrb[0].mxu0 %v247_v42  ;;  %v268_v54 = vsub.f32 %v266_v43, %v267_v50 }
  0x22   : > { %1083 = vmatpush3.bf16.msra.mxu0 %v1080_v20  ;;  %v239_v52 = vand.u32 4294901760, %v238_v48  ;;  %1017 = vmatprep.mubr.f32.mxu0 %v257_v44  ;;  %v249_v53 = vand.u32 4294901760, %v248_v49  ;;  %v259_v55 = vand.u32 4294901760, %v258_v51 }
  0x23   : > { %1085 = vmatprep.subr.bf16.mxu0 %v1084_v45  ;;  %v269_v57 = vand.u32 4294901760, %v268_v54 }
  0x24   : > { %972 = vmatprep.mubr.f32.mxu1 %v239_v52 }
  0x25   : > { %973 = vmatmul.mubr.f32.vlgmr.msra.gmra.mrb[0].mxu1 %v249_v53  ;;  %1018 = vmatmul.mubr.f32.gmra.mrb[2].mxu0 %v267_v50 }
  0x26   : > { %1059 = vmatpush3.bf16.msra.mxu1 %v1056_v38  ;;  %1087 = vmatpush3.bf16.msra.mxu0 %v1084_v45 }
  0x27   : > { %975 = vmatprep.mubr.f32.mxu1 %v259_v55  ;;  %1061 = vmatprep.subr.bf16.mxu1 %v1060_v56 }
  0x28   : > { %1028 = vmatprep.mubr.f32.mxu0 %v1334_v28  ;;  %1089 = vmatprep.subr.bf16.mxu0 %v1304_v8 }
  0x29   : > { %976 = vmatmul.mubr.f32.gmra.mrb[2].mxu1 %v269_v57  ;;  %1029 = vmatmul.mubr.f32.vlgmr.msra.gmra.mrb[0].mxu0 %v1336_v29 }
  0x2a   : > { %1063 = vmatpush3.bf16.msra.mxu1 %v1060_v56  ;;  %1091 = vmatpush3.bf16.msra.mxu0 %v1304_v8 }
  0x2b   : > { %986 = vmatprep.mubr.f32.mxu1 %v1334_v28  ;;  %1065 = vmatprep.subr.bf16.mxu1 %v1064_v58 }
  0x2c   : > { %1031 = vmatprep.mubr.f32.mxu0 %v255_v32  ;;  %1093 = vmatprep.subr.bf16.mxu0 %v1312_v12 }
  0x2d   : > { %987 = vmatmul.mubr.f32.vlgmr.msra.gmra.mrb[0].mxu1 %v1336_v29  ;;  %1032 = vmatmul.mubr.f32.gmra.mrb[2].mxu0 %v265_v39 }
  0x2e   : > { %1067 = vmatpush3.bf16.msra.mxu1 %v1064_v58  ;;  %1095 = vmatpush3.bf16.msra.mxu0 %v1312_v12 }
  0x2f   : > { %989 = vmatprep.mubr.f32.mxu1 %v255_v32  ;;  %1069 = vmatprep.subr.bf16.mxu1 %v1068_v59 }
  0x30   : > { %1042 = vmatprep.mubr.f32.mxu0 %v1334_v28 }
  0x31   : > { %990 = vmatmul.mubr.f32.gmra.mrb[2].mxu1 %v265_v39  ;;  %1043 = vmatmul.mubr.f32.vlgmr.msra.gmra.mrb[0].mxu0 %v1336_v29 }
  0x32   : > { %1071 = vmatpush3.bf16.msra.mxu1 %v1068_v59  ;;  %1000 = vmatprep.mubr.f32.mxu1 %v236_v36 }
  0x33   : > { %1045 = vmatprep.mubr.f32.mxu0 %v255_v32 }
  0x35   : > { %1001 = vmatmul.mubr.f32.vlgmr.msra.gmra.mrb[0].mxu1 %v246_v37  ;;  %1046 = vmatmul.mubr.f32.gmra.mrb[2].mxu0 %v265_v39 }
  0x36   : > { %1003 = vmatprep.mubr.f32.mxu1 %v256_v40 }
  0x39   : > { %1004 = vmatmul.mubr.f32.gmra.mrb[2].mxu1 %v266_v43 }
 0x104   : > { %v1044_v60 = vpop.f32.mrb[0].mxu0 }
 0x105   : > { %v758_v61 = vpop.f32.mrb[1].mxu0 }
 0x108   : > { %v1002_v62 = vpop.f32.mrb[0].mxu1  ;;  %v1047_v63 = vpop.f32.mrb[2].mxu0 }
 0x109   : > { %v1096_v0 = vadd.f32 %v1044_v60, %v1002_v62  ;;  %v460_v1 = vpop.f32.mrb[1].mxu1  ;;  %v770_v2 = vpop.f32.mrb[3].mxu0 }
 0x10a   : > { %v1097_v3 = vadd.f32 %v758_v61, %v460_v1 }
 0x10b   : > { %781 = vst.msk [vmem:[%s1362_s8 + $0x8] sm:$0xff] %vm153_vm0, %v1096_v0  ;;  %812 = vrot.lane.b32.xlu1 %v1096_v0, %s1223_s14  ;;  %790 = vrot.lane.b32.xlu0 %v1096_v0, %s1224_s16 }
 0x10c   : > { %780 = vst.msk [vmem:[%s1362_s8] sm:$0xff] %vm153_vm0, %v1097_v3  ;;  %v1005_v4 = vpop.f32.mrb[2].mxu1 }
 0x10d   : > { %v1098_v5 = vadd.f32 %v1047_v63, %v1005_v4  ;;  %v474_v6 = vpop.f32.mrb[3].mxu1 }
 0x10e   : > { %v1099_v7 = vadd.f32 %v770_v2, %v474_v6 }
 0x10f   : > { %783 = vst.msk [vmem:[%s1362_s8 + $0x18] sm:$0xff] %vm153_vm0, %v1098_v5  ;;  %788 = vrot.lane.b32.xlu0 %v1097_v3, %s1224_s16  ;;  %794 = vrot.lane.b32.xlu1 %v1098_v5, %s1224_s16 }
 0x110   : > { %782 = vst.msk [vmem:[%s1362_s8 + $0x10] sm:$0xff] %vm153_vm0, %v1099_v7 }
 0x113   : > { %810 = vrot.lane.b32.xlu0 %v1097_v3, %s1223_s14  ;;  %792 = vrot.lane.b32.xlu1 %v1099_v7, %s1224_s16 }
 0x117   : > { %814 = vrot.lane.b32.xlu0 %v1099_v7, %s1223_s14  ;;  %816 = vrot.lane.b32.xlu1 %v1098_v5, %s1223_s14 }
 0x17d   : > { %v813_v8 = vpop.permute.xlu1 %812  ;;  %v791_v9 = vpop.permute.xlu0 %790 }
 0x17e   : > { %802 = vst.msk [vmem:[%s1362_s8 + $0x8] sm:$0xff] %vm800_vm1, %v791_v9 }
 0x17f   : > { %807 = vst.msk [vmem:[%s1362_s8 + $0x8] sm:$0xff] %vm805_vm2, %v791_v9 }
 0x180   : > { %824 = vst.msk [vmem:[%s1362_s8 + $0x8] sm:$0xff] %vm822_vm3, %v813_v8 }
 0x181   : > { %v789_v10 = vpop.permute.xlu0 %788  ;;  %v795_v11 = vpop.permute.xlu1 %794 }
 0x182   : > { %801 = vst.msk [vmem:[%s1362_s8] sm:$0xff] %vm800_vm1, %v789_v10  ;;  %804 = vst.msk [vmem:[%s1362_s8 + $0x18] sm:$0xff] %vm800_vm1, %v795_v11 }
 0x183   : > { %806 = vst.msk [vmem:[%s1362_s8] sm:$0xff] %vm805_vm2, %v789_v10  ;;  %809 = vst.msk [vmem:[%s1362_s8 + $0x18] sm:$0xff] %vm805_vm2, %v795_v11 }
 0x185   : > { %v811_v12 = vpop.permute.xlu0 %810  ;;  %v793_v13 = vpop.permute.xlu1 %792 }
 0x186   : > { %823 = vst.msk [vmem:[%s1362_s8] sm:$0xff] %vm822_vm3, %v811_v12 }
 0x187   : > { %803 = vst.msk [vmem:[%s1362_s8 + $0x10] sm:$0xff] %vm800_vm1, %v793_v13 }
 0x188   : > { %808 = vst.msk [vmem:[%s1362_s8 + $0x10] sm:$0xff] %vm805_vm2, %v793_v13 }
 0x189   : > { %v815_v14 = vpop.permute.xlu0 %814  ;;  %v817_v15 = vpop.permute.xlu1 %816 }
 0x18a   : > { %825 = vst.msk [vmem:[%s1362_s8 + $0x10] sm:$0xff] %vm822_vm3, %v815_v14  ;;  %826 = vst.msk [vmem:[%s1362_s8 + $0x18] sm:$0xff] %vm822_vm3, %v817_v15 }
 0x18b   : > { %1172 = shalt.err (!%p1169_p3)
}
 0x18c   : > { %s1173_s29 = scalar_lea.hbm %s1397_s24, 512  ;;  %s1177_s4 = scalar_lea.hbm %s1450_s2, 1024 }
 0x18d   : > { %p1174_p4 = scmp.ne.s32.totalorder %s1397_s24, %s1173_s29  ;;  %p1178_p9 = scmp.lt.u32.totalorder %s1397_s24, %s1450_s2 }
 0x18e   : > { %p1179_p10 = scmp.lt.u32.totalorder %s1177_s4, %s1173_s29  ;;  %p1181_p12 = scmp.lt.u32.totalorder %s1173_s29, %s1397_s24 }
 0x18f   : > { %p1175_p7 = pnand %p1174_p4, %p1281_p5 }
 0x190   : > { %p1180_p11 = por %p1179_p10, %p1178_p9 }
 0x191   : > { %p1176_p8 = pneg %p1175_p7 }
 0x192   : > { %p1182_p13 = por %p1181_p12, %p1180_p11 }
 0x194   : > { %p1183_p0 = pnand %p1182_p13, %p1176_p8 }
 0x196   : > { %1186 = shalt.err (!%p1183_p0)
}
 0x197   : > { %s1226_s7 = smov 128   ;;  %s1227_s8 = smov 8  }
 0x198   : > { %1116 = dma.vmem_to_hbm [thread:$0]  (%p1281_p5), %s1399_s21, 512, %s1397_s24, %s1407_s13, %s1226_s7, %s1226_s7, %s1227_s8  }
 0x199 PF: > { %p1122_p1 = scmp.ge.s32.totalorder %s1221_s12, 2  ;;  %s856_s14 = sand.u32 1, %s1209_s9  }
 0x19a   : > { %s857_s16 = scalar_lea.sflag [#allocation3], %s856_s14 }
 0x19b   : > { %p1119_p2 = pnand %p1122_p1, %p1285_p6 }
 0x19d   : > { %1204 = dma.done.wait (!%p1119_p2), %s857_s16, 512  }
 0x19e   : > { %1206 = vsyncadd (!%p1119_p2), %s857_s16, 4294966784  ;;  %p12_p3 = scmp.ge.s32.totalorder %s1268_s15, 4   ;;  %s1453_s9 = smov %s1213_s10 }
 0x19f   : > { %s1454_s10 = smov %s1217_s11  ;;  %s1455_s11 = smov %s1279_s18 }
 0x1a0   : > { %s1456_s12 = smov %s1268_s15  ;;  %14 = sbr.rel (!%p12_p3) target bundleno = 3 (0x3), region = 63 }
 0x1a7   :  { %862 = vsyncpa [#allocation3], 1 }
 0x1a8   :  { %864 = vsyncpa [#allocation3 + $0x1], 1 }

</bundles_post_ra>
